<compile_context>
chip_gen: v7x
topology: tpu7x:2x2x1
jax: 0.10.0
libtpu: 0.0.40
codegen_flags: <defaults>
</compile_context>

<pallas_src>
import functools

import jax
import jax.numpy as jnp
from jax import lax
from jax.experimental import pallas as pl
from jax.experimental.pallas import tpu as pltpu


def rnn_kernel(seq_ref,        # SMEM (scalar prefetch): (batch*seq_len,) int32 token ids
               emb_ref,        # VMEM: (vocab, input_dim)
               w_ih_ref,       # VMEM: (input_dim, hidden_dim)
               w_hh_ref,       # VMEM: (hidden_dim, hidden_dim)
               b_hh_ref,       # VMEM: (1, hidden_dim)
               w_lin_ref,      # VMEM: (hidden_dim, output_dim)  (Linear weight, transposed)
               b_lin_ref,      # VMEM: (1, output_dim)
               packed_ref,     # VMEM out: (batch, packed_width)
               proj_scratch,   # VMEM scratch: (vocab, hidden_dim)   -- E @ W_ih + b_hh
               xw_scratch,     # VMEM scratch: (seq_len*batch, hidden_dim)
               *, batch, seq_len, hidden_dim, pad_width):
    # 1) Pre-project the whole embedding table once (one MXU pass):
    #    proj[v, :] = embed[v, :] @ W_ih + b_hh
    #    Every gathered row below is then already "x_t @ W_ih + b_hh", so the
    #    serial recurrence carries zero input-projection work.
    proj_scratch[...] = (
        jnp.dot(emb_ref[...], w_ih_ref[...], preferred_element_type=jnp.float32)
        + b_hh_ref[...])

    # 2) Fused embedding gather (token ids are SMEM scalars via scalar prefetch):
    #    xw_scratch[t*batch + b, :] = proj[word_seq[b, t], :]
    for t in range(seq_len):
        for b in range(batch):
            tok = seq_ref[b * seq_len + t]
            xw_scratch[pl.ds(t * batch + b, 1), :] = proj_scratch[pl.ds(tok, 1), :]

    # 3) Serial recurrence (unavoidable dependency chain), fully unrolled:
    #    h_t = tanh(xw_t + h_{t-1} @ W_hh)
    w_hh = w_hh_ref[...]

    def step(t, h):
        start = pl.multiple_of(t * batch, batch)
        xw_t = xw_scratch[pl.ds(start, batch), :]
        return jnp.tanh(
            xw_t + jnp.dot(h, w_hh, preferred_element_type=jnp.float32))

    h0 = jnp.zeros((batch, hidden_dim), jnp.float32)
    h = lax.fori_loop(0, seq_len, step, h0, unroll=True)

    # 4) Epilogue: linear head + softmax, packed into one lane-dense slab
    #    [logits | softmax | hidden | zero pad]  ->  single unmasked store.
    y = (jnp.dot(h, w_lin_ref[...], preferred_element_type=jnp.float32)
         + b_lin_ref[...])
    m = jnp.max(y, axis=1, keepdims=True)
    e = jnp.exp(y - m)
    p = e * pl.reciprocal(jnp.sum(e, axis=1, keepdims=True), approx=True)

    pieces = [y, p, h]
    if pad_width > 0:
        pieces.append(jnp.zeros((batch, pad_width), jnp.float32))
    packed_ref[...] = jnp.concatenate(pieces, axis=1)


@jax.jit
def rnn_forward(word_seq, embed_table, w_ih, w_hh, b_hh, w_lin_t, b_lin):
    """word_seq: (batch, seq_len) int32 token ids. Returns {'output','pred','hidden'}."""
    batch, seq_len = word_seq.shape
    if seq_len == 0:
        raise ValueError("seq_len must be >= 1")
    vocab_size, input_dim = embed_table.shape
    hidden_dim = w_hh.shape[0]
    output_dim = w_lin_t.shape[1]

    total = 2 * output_dim + hidden_dim
    packed_width = ((total + 127) // 128) * 128   # lane-dense output slab
    pad_width = packed_width - total

    kernel = functools.partial(
        rnn_kernel, batch=batch, seq_len=seq_len,
        hidden_dim=hidden_dim, pad_width=pad_width)

    packed = pl.pallas_call(
        kernel,
        out_shape=jax.ShapeDtypeStruct((batch, packed_width), jnp.float32),
        grid_spec=pltpu.PrefetchScalarGridSpec(
            num_scalar_prefetch=1,              # word_seq -> SMEM
            grid=(1,),                          # whole forward in one grid step
            in_specs=[
                pl.BlockSpec((vocab_size, input_dim), lambda i, seq: (0, 0)),   # embed
                pl.BlockSpec((input_dim, hidden_dim), lambda i, seq: (0, 0)),   # W_ih
                pl.BlockSpec((hidden_dim, hidden_dim), lambda i, seq: (0, 0)),  # W_hh
                pl.BlockSpec((1, hidden_dim), lambda i, seq: (0, 0)),           # bias_hh
                pl.BlockSpec((hidden_dim, output_dim), lambda i, seq: (0, 0)),  # W_lin^T
                pl.BlockSpec((1, output_dim), lambda i, seq: (0, 0)),           # b_lin
            ],
            out_specs=pl.BlockSpec((batch, packed_width), lambda i, seq: (0, 0)),
            scratch_shapes=[
                pltpu.VMEM((vocab_size, hidden_dim), jnp.float32),        # proj = E@W_ih + b
                pltpu.VMEM((seq_len * batch, hidden_dim), jnp.float32),   # gathered xw rows
            ],
        ),
        compiler_params=pltpu.CompilerParams(
            dimension_semantics=("arbitrary",),
        ),
    )(word_seq.reshape(-1).astype(jnp.int32),
      embed_table.astype(jnp.float32),
      w_ih.astype(jnp.float32),
      w_hh.astype(jnp.float32),
      b_hh.reshape(1, hidden_dim).astype(jnp.float32),
      w_lin_t.astype(jnp.float32),
      b_lin.reshape(1, output_dim).astype(jnp.float32))

    out = packed[:, :output_dim]
    pred = packed[:, output_dim:2 * output_dim]
    hidden = packed[:, 2 * output_dim:2 * output_dim + hidden_dim]
    return {"output": out, "pred": pred, "hidden": hidden}


def xavier_uniform(key, shape):
    fan_in, fan_out = shape
    limit = jnp.sqrt(6.0 / (fan_in + fan_out))
    return jax.random.uniform(key, shape, jnp.float32, -limit, limit)


if __name__ == "__main__":
    # Model dims (small, consistent with the module's forward).
    vocab_size, input_dim, hidden_dim, output_dim = 50, 16, 32, 8
    batch, seq_len = 2, 8

    root = jax.random.PRNGKey(0)
    k_embed, k_wih, k_whh, k_wlin, k_blin, k_tokens = jax.random.split(root, 6)

    # Deterministic parameter init mirroring the PyTorch module.
    embed_table = jax.random.normal(k_embed, (vocab_size, input_dim), jnp.float32)
    w_ih = xavier_uniform(k_wih, (input_dim, hidden_dim))
    w_hh = xavier_uniform(k_whh, (hidden_dim, hidden_dim))
    b_hh = jnp.zeros((hidden_dim,), jnp.float32)
    lin_limit = 1.0 / jnp.sqrt(hidden_dim)
    w_lin_t = jax.random.uniform(k_wlin, (hidden_dim, output_dim), jnp.float32, -lin_limit, lin_limit)
    b_lin = jax.random.uniform(k_blin, (output_dim,), jnp.float32, -lin_limit, lin_limit)

    word_seq = jax.random.randint(k_tokens, (batch, seq_len), 0, vocab_size, jnp.int32)

    result = rnn_forward(word_seq, embed_table, w_ih, w_hh, b_hh, w_lin_t, b_lin)
    jax.block_until_ready(result)

    # Pure-JAX reference check (mirrors the PyTorch module's forward).
    x_ref = jnp.transpose(jnp.take(embed_table, word_seq, axis=0), (1, 0, 2))
    h = jnp.zeros((batch, hidden_dim), jnp.float32)
    for t in range(seq_len):
        h = jnp.tanh(x_ref[t] @ w_ih + h @ w_hh + b_hh)
    y_ref = h @ w_lin_t + b_lin
    pred_ref = jax.nn.softmax(y_ref, axis=1)

    assert jnp.allclose(result["output"], y_ref, atol=1e-4), "output mismatch"
    assert jnp.allclose(result["pred"], pred_ref, atol=5e-4), "pred mismatch"
    assert jnp.allclose(result["hidden"], h, atol=1e-4), "hidden mismatch"

    print("KERNEL_OK")
</pallas_src>

<mosaic_0001>
module attributes {stable_mosaic.version = 11 : i64} {
  func.func @rnn_kernel(%arg0: i32, %arg1: memref<16xi32, #tpu.memory_space<smem>>, %arg2: memref<50x16xf32, #tpu.memory_space<vmem>>, %arg3: memref<16x32xf32, #tpu.memory_space<vmem>>, %arg4: memref<32x32xf32, #tpu.memory_space<vmem>>, %arg5: memref<1x32xf32, #tpu.memory_space<vmem>>, %arg6: memref<32x8xf32, #tpu.memory_space<vmem>>, %arg7: memref<1x8xf32, #tpu.memory_space<vmem>>, %arg8: memref<2x128xf32, #tpu.memory_space<vmem>>, %arg9: memref<50x32xf32, #tpu.memory_space<vmem>>, %arg10: memref<16x32xf32, #tpu.memory_space<vmem>>) attributes {dimension_semantics = [#tpu.dimension_semantics<arbitrary>], iteration_bounds = array<i64: 1>, scalar_prefetch = 1 : i64, scratch_operands = 2 : i64, tpu.core_type = #tpu.core_type<tc>, window_params = [{pipeline_mode = #tpu.pipeline_mode<synchronous>, transform_indices = @transform_0, window_bounds = array<i64: 50, 16>}, {pipeline_mode = #tpu.pipeline_mode<synchronous>, transform_indices = @transform_1, window_bounds = array<i64: 16, 32>}, {pipeline_mode = #tpu.pipeline_mode<synchronous>, transform_indices = @transform_2, window_bounds = array<i64: 32, 32>}, {pipeline_mode = #tpu.pipeline_mode<synchronous>, transform_indices = @transform_3, window_bounds = array<i64: 1, 32>}, {pipeline_mode = #tpu.pipeline_mode<synchronous>, transform_indices = @transform_4, window_bounds = array<i64: 32, 8>}, {pipeline_mode = #tpu.pipeline_mode<synchronous>, transform_indices = @transform_5, window_bounds = array<i64: 1, 8>}, {pipeline_mode = #tpu.pipeline_mode<synchronous>, transform_indices = @transform_6, window_bounds = array<i64: 2, 128>}]} {
    %c0 = arith.constant 0 : index
    %c0_0 = arith.constant 0 : index
    %0 = vector.load %arg2[%c0, %c0_0] : memref<50x16xf32, #tpu.memory_space<vmem>>, vector<50x16xf32>
    %c0_1 = arith.constant 0 : index
    %c0_2 = arith.constant 0 : index
    %1 = vector.load %arg3[%c0_1, %c0_2] : memref<16x32xf32, #tpu.memory_space<vmem>>, vector<16x32xf32>
    %cst = arith.constant dense<0.000000e+00> : vector<50x32xf32>
    %2 = tpu.matmul %0, %1, %cst {dimension_numbers = #tpu.dot_dimension_numbers<[1], [0], [0], [1], [0, 0, 1, 1], [], []>} : vector<50x16xf32>, vector<16x32xf32>, vector<50x32xf32> -> vector<50x32xf32>
    %c0_3 = arith.constant 0 : index
    %c0_4 = arith.constant 0 : index
    %3 = vector.load %arg5[%c0_3, %c0_4] : memref<1x32xf32, #tpu.memory_space<vmem>>, vector<1x32xf32>
    %4 = vector.broadcast %3 : vector<1x32xf32> to vector<50x32xf32>
    %5 = arith.addf %2, %4 : vector<50x32xf32>
    %c0_5 = arith.constant 0 : index
    %c0_6 = arith.constant 0 : index
    %6 = vector.load %arg9[%c0_5, %c0_6] : memref<50x32xf32, #tpu.memory_space<vmem>>, vector<50x32xf32>
    tpu.vector_store %arg9[%c0_5, %c0_6], %5 {strides = array<i32>} : memref<50x32xf32, #tpu.memory_space<vmem>>, vector<50x32xf32>,
    %c0_7 = arith.constant 0 : index
    %7 = memref.load %arg1[%c0_7] : memref<16xi32, #tpu.memory_space<smem>>
    %8 = arith.index_cast %7 : i32 to index
    %c0_8 = arith.constant 0 : index
    %9 = vector.load %arg9[%8, %c0_8] : memref<50x32xf32, #tpu.memory_space<vmem>>, vector<1x32xf32>
    %c0_9 = arith.constant 0 : index
    %c0_10 = arith.constant 0 : index
    %10 = vector.load %arg10[%c0_9, %c0_10] : memref<16x32xf32, #tpu.memory_space<vmem>>, vector<1x32xf32>
    tpu.vector_store %arg10[%c0_9, %c0_10], %9 {strides = array<i32>} : memref<16x32xf32, #tpu.memory_space<vmem>>, vector<1x32xf32>,
    %c8 = arith.constant 8 : index
    %11 = memref.load %arg1[%c8] : memref<16xi32, #tpu.memory_space<smem>>
    %12 = arith.index_cast %11 : i32 to index
    %c0_11 = arith.constant 0 : index
    %13 = vector.load %arg9[%12, %c0_11] : memref<50x32xf32, #tpu.memory_space<vmem>>, vector<1x32xf32>
    %c1 = arith.constant 1 : index
    %c0_12 = arith.constant 0 : index
    %14 = vector.load %arg10[%c1, %c0_12] : memref<16x32xf32, #tpu.memory_space<vmem>>, vector<1x32xf32>
    tpu.vector_store %arg10[%c1, %c0_12], %13 {strides = array<i32>} : memref<16x32xf32, #tpu.memory_space<vmem>>, vector<1x32xf32>,
    %c1_13 = arith.constant 1 : index
    %15 = memref.load %arg1[%c1_13] : memref<16xi32, #tpu.memory_space<smem>>
    %16 = arith.index_cast %15 : i32 to index
    %c0_14 = arith.constant 0 : index
    %17 = vector.load %arg9[%16, %c0_14] : memref<50x32xf32, #tpu.memory_space<vmem>>, vector<1x32xf32>
    %c2 = arith.constant 2 : index
    %c0_15 = arith.constant 0 : index
    %18 = vector.load %arg10[%c2, %c0_15] : memref<16x32xf32, #tpu.memory_space<vmem>>, vector<1x32xf32>
    tpu.vector_store %arg10[%c2, %c0_15], %17 {strides = array<i32>} : memref<16x32xf32, #tpu.memory_space<vmem>>, vector<1x32xf32>,
    %c9 = arith.constant 9 : index
    %19 = memref.load %arg1[%c9] : memref<16xi32, #tpu.memory_space<smem>>
    %20 = arith.index_cast %19 : i32 to index
    %c0_16 = arith.constant 0 : index
    %21 = vector.load %arg9[%20, %c0_16] : memref<50x32xf32, #tpu.memory_space<vmem>>, vector<1x32xf32>
    %c3 = arith.constant 3 : index
    %c0_17 = arith.constant 0 : index
    %22 = vector.load %arg10[%c3, %c0_17] : memref<16x32xf32, #tpu.memory_space<vmem>>, vector<1x32xf32>
    tpu.vector_store %arg10[%c3, %c0_17], %21 {strides = array<i32>} : memref<16x32xf32, #tpu.memory_space<vmem>>, vector<1x32xf32>,
    %c2_18 = arith.constant 2 : index
    %23 = memref.load %arg1[%c2_18] : memref<16xi32, #tpu.memory_space<smem>>
    %24 = arith.index_cast %23 : i32 to index
    %c0_19 = arith.constant 0 : index
    %25 = vector.load %arg9[%24, %c0_19] : memref<50x32xf32, #tpu.memory_space<vmem>>, vector<1x32xf32>
    %c4 = arith.constant 4 : index
    %c0_20 = arith.constant 0 : index
    %26 = vector.load %arg10[%c4, %c0_20] : memref<16x32xf32, #tpu.memory_space<vmem>>, vector<1x32xf32>
    tpu.vector_store %arg10[%c4, %c0_20], %25 {strides = array<i32>} : memref<16x32xf32, #tpu.memory_space<vmem>>, vector<1x32xf32>,
    %c10 = arith.constant 10 : index
    %27 = memref.load %arg1[%c10] : memref<16xi32, #tpu.memory_space<smem>>
    %28 = arith.index_cast %27 : i32 to index
    %c0_21 = arith.constant 0 : index
    %29 = vector.load %arg9[%28, %c0_21] : memref<50x32xf32, #tpu.memory_space<vmem>>, vector<1x32xf32>
    %c5 = arith.constant 5 : index
    %c0_22 = arith.constant 0 : index
    %30 = vector.load %arg10[%c5, %c0_22] : memref<16x32xf32, #tpu.memory_space<vmem>>, vector<1x32xf32>
    tpu.vector_store %arg10[%c5, %c0_22], %29 {strides = array<i32>} : memref<16x32xf32, #tpu.memory_space<vmem>>, vector<1x32xf32>,
    %c3_23 = arith.constant 3 : index
    %31 = memref.load %arg1[%c3_23] : memref<16xi32, #tpu.memory_space<smem>>
    %32 = arith.index_cast %31 : i32 to index
    %c0_24 = arith.constant 0 : index
    %33 = vector.load %arg9[%32, %c0_24] : memref<50x32xf32, #tpu.memory_space<vmem>>, vector<1x32xf32>
    %c6 = arith.constant 6 : index
    %c0_25 = arith.constant 0 : index
    %34 = vector.load %arg10[%c6, %c0_25] : memref<16x32xf32, #tpu.memory_space<vmem>>, vector<1x32xf32>
    tpu.vector_store %arg10[%c6, %c0_25], %33 {strides = array<i32>} : memref<16x32xf32, #tpu.memory_space<vmem>>, vector<1x32xf32>,
    %c11 = arith.constant 11 : index
    %35 = memref.load %arg1[%c11] : memref<16xi32, #tpu.memory_space<smem>>
    %36 = arith.index_cast %35 : i32 to index
    %c0_26 = arith.constant 0 : index
    %37 = vector.load %arg9[%36, %c0_26] : memref<50x32xf32, #tpu.memory_space<vmem>>, vector<1x32xf32>
    %c7 = arith.constant 7 : index
    %c0_27 = arith.constant 0 : index
    %38 = vector.load %arg10[%c7, %c0_27] : memref<16x32xf32, #tpu.memory_space<vmem>>, vector<1x32xf32>
    tpu.vector_store %arg10[%c7, %c0_27], %37 {strides = array<i32>} : memref<16x32xf32, #tpu.memory_space<vmem>>, vector<1x32xf32>,
    %c4_28 = arith.constant 4 : index
    %39 = memref.load %arg1[%c4_28] : memref<16xi32, #tpu.memory_space<smem>>
    %40 = arith.index_cast %39 : i32 to index
    %c0_29 = arith.constant 0 : index
    %41 = vector.load %arg9[%40, %c0_29] : memref<50x32xf32, #tpu.memory_space<vmem>>, vector<1x32xf32>
    %c8_30 = arith.constant 8 : index
    %c0_31 = arith.constant 0 : index
    %42 = vector.load %arg10[%c8_30, %c0_31] : memref<16x32xf32, #tpu.memory_space<vmem>>, vector<1x32xf32>
    tpu.vector_store %arg10[%c8_30, %c0_31], %41 {strides = array<i32>} : memref<16x32xf32, #tpu.memory_space<vmem>>, vector<1x32xf32>,
    %c12 = arith.constant 12 : index
    %43 = memref.load %arg1[%c12] : memref<16xi32, #tpu.memory_space<smem>>
    %44 = arith.index_cast %43 : i32 to index
    %c0_32 = arith.constant 0 : index
    %45 = vector.load %arg9[%44, %c0_32] : memref<50x32xf32, #tpu.memory_space<vmem>>, vector<1x32xf32>
    %c9_33 = arith.constant 9 : index
    %c0_34 = arith.constant 0 : index
    %46 = vector.load %arg10[%c9_33, %c0_34] : memref<16x32xf32, #tpu.memory_space<vmem>>, vector<1x32xf32>
    tpu.vector_store %arg10[%c9_33, %c0_34], %45 {strides = array<i32>} : memref<16x32xf32, #tpu.memory_space<vmem>>, vector<1x32xf32>,
    %c5_35 = arith.constant 5 : index
    %47 = memref.load %arg1[%c5_35] : memref<16xi32, #tpu.memory_space<smem>>
    %48 = arith.index_cast %47 : i32 to index
    %c0_36 = arith.constant 0 : index
    %49 = vector.load %arg9[%48, %c0_36] : memref<50x32xf32, #tpu.memory_space<vmem>>, vector<1x32xf32>
    %c10_37 = arith.constant 10 : index
    %c0_38 = arith.constant 0 : index
    %50 = vector.load %arg10[%c10_37, %c0_38] : memref<16x32xf32, #tpu.memory_space<vmem>>, vector<1x32xf32>
    tpu.vector_store %arg10[%c10_37, %c0_38], %49 {strides = array<i32>} : memref<16x32xf32, #tpu.memory_space<vmem>>, vector<1x32xf32>,
    %c13 = arith.constant 13 : index
    %51 = memref.load %arg1[%c13] : memref<16xi32, #tpu.memory_space<smem>>
    %52 = arith.index_cast %51 : i32 to index
    %c0_39 = arith.constant 0 : index
    %53 = vector.load %arg9[%52, %c0_39] : memref<50x32xf32, #tpu.memory_space<vmem>>, vector<1x32xf32>
    %c11_40 = arith.constant 11 : index
    %c0_41 = arith.constant 0 : index
    %54 = vector.load %arg10[%c11_40, %c0_41] : memref<16x32xf32, #tpu.memory_space<vmem>>, vector<1x32xf32>
    tpu.vector_store %arg10[%c11_40, %c0_41], %53 {strides = array<i32>} : memref<16x32xf32, #tpu.memory_space<vmem>>, vector<1x32xf32>,
    %c6_42 = arith.constant 6 : index
    %55 = memref.load %arg1[%c6_42] : memref<16xi32, #tpu.memory_space<smem>>
    %56 = arith.index_cast %55 : i32 to index
    %c0_43 = arith.constant 0 : index
    %57 = vector.load %arg9[%56, %c0_43] : memref<50x32xf32, #tpu.memory_space<vmem>>, vector<1x32xf32>
    %c12_44 = arith.constant 12 : index
    %c0_45 = arith.constant 0 : index
    %58 = vector.load %arg10[%c12_44, %c0_45] : memref<16x32xf32, #tpu.memory_space<vmem>>, vector<1x32xf32>
    tpu.vector_store %arg10[%c12_44, %c0_45], %57 {strides = array<i32>} : memref<16x32xf32, #tpu.memory_space<vmem>>, vector<1x32xf32>,
    %c14 = arith.constant 14 : index
    %59 = memref.load %arg1[%c14] : memref<16xi32, #tpu.memory_space<smem>>
    %60 = arith.index_cast %59 : i32 to index
    %c0_46 = arith.constant 0 : index
    %61 = vector.load %arg9[%60, %c0_46] : memref<50x32xf32, #tpu.memory_space<vmem>>, vector<1x32xf32>
    %c13_47 = arith.constant 13 : index
    %c0_48 = arith.constant 0 : index
    %62 = vector.load %arg10[%c13_47, %c0_48] : memref<16x32xf32, #tpu.memory_space<vmem>>, vector<1x32xf32>
    tpu.vector_store %arg10[%c13_47, %c0_48], %61 {strides = array<i32>} : memref<16x32xf32, #tpu.memory_space<vmem>>, vector<1x32xf32>,
    %c7_49 = arith.constant 7 : index
    %63 = memref.load %arg1[%c7_49] : memref<16xi32, #tpu.memory_space<smem>>
    %64 = arith.index_cast %63 : i32 to index
    %c0_50 = arith.constant 0 : index
    %65 = vector.load %arg9[%64, %c0_50] : memref<50x32xf32, #tpu.memory_space<vmem>>, vector<1x32xf32>
    %c14_51 = arith.constant 14 : index
    %c0_52 = arith.constant 0 : index
    %66 = vector.load %arg10[%c14_51, %c0_52] : memref<16x32xf32, #tpu.memory_space<vmem>>, vector<1x32xf32>
    tpu.vector_store %arg10[%c14_51, %c0_52], %65 {strides = array<i32>} : memref<16x32xf32, #tpu.memory_space<vmem>>, vector<1x32xf32>,
    %c15 = arith.constant 15 : index
    %67 = memref.load %arg1[%c15] : memref<16xi32, #tpu.memory_space<smem>>
    %68 = arith.index_cast %67 : i32 to index
    %c0_53 = arith.constant 0 : index
    %69 = vector.load %arg9[%68, %c0_53] : memref<50x32xf32, #tpu.memory_space<vmem>>, vector<1x32xf32>
    %c15_54 = arith.constant 15 : index
    %c0_55 = arith.constant 0 : index
    %70 = vector.load %arg10[%c15_54, %c0_55] : memref<16x32xf32, #tpu.memory_space<vmem>>, vector<1x32xf32>
    tpu.vector_store %arg10[%c15_54, %c0_55], %69 {strides = array<i32>} : memref<16x32xf32, #tpu.memory_space<vmem>>, vector<1x32xf32>,
    %c0_56 = arith.constant 0 : index
    %c0_57 = arith.constant 0 : index
    %71 = vector.load %arg4[%c0_56, %c0_57] : memref<32x32xf32, #tpu.memory_space<vmem>>, vector<32x32xf32>
    %cst_58 = arith.constant 0.000000e+00 : f32
    %72 = vector.broadcast %cst_58 : f32 to vector<2x32xf32>
    %c0_i32 = arith.constant 0 : i32
    %c2_i32 = arith.constant 2 : i32
    %73 = arith.muli %c0_i32, %c2_i32 : i32
    %74 = tpu.assume_multiple %73, 2 : i32
    %75 = arith.index_cast %74 : i32 to index
    %c0_59 = arith.constant 0 : index
    %76 = vector.load %arg10[%75, %c0_59] : memref<16x32xf32, #tpu.memory_space<vmem>>, vector<2x32xf32>
    %cst_60 = arith.constant dense<0.000000e+00> : vector<2x32xf32>
    %77 = tpu.matmul %72, %71, %cst_60 {dimension_numbers = #tpu.dot_dimension_numbers<[1], [0], [0], [1], [0, 0, 1, 1], [], []>} : vector<2x32xf32>, vector<32x32xf32>, vector<2x32xf32> -> vector<2x32xf32>
    %78 = arith.addf %76, %77 : vector<2x32xf32>
    %79 = math.tanh %78 : vector<2x32xf32>
    %c1_i32 = arith.constant 1 : i32
    %c2_i32_61 = arith.constant 2 : i32
    %80 = arith.muli %c1_i32, %c2_i32_61 : i32
    %81 = tpu.assume_multiple %80, 2 : i32
    %82 = arith.index_cast %81 : i32 to index
    %c0_62 = arith.constant 0 : index
    %83 = vector.load %arg10[%82, %c0_62] : memref<16x32xf32, #tpu.memory_space<vmem>>, vector<2x32xf32>
    %cst_63 = arith.constant dense<0.000000e+00> : vector<2x32xf32>
    %84 = tpu.matmul %79, %71, %cst_63 {dimension_numbers = #tpu.dot_dimension_numbers<[1], [0], [0], [1], [0, 0, 1, 1], [], []>} : vector<2x32xf32>, vector<32x32xf32>, vector<2x32xf32> -> vector<2x32xf32>
    %85 = arith.addf %83, %84 : vector<2x32xf32>
    %86 = math.tanh %85 : vector<2x32xf32>
    %c2_i32_64 = arith.constant 2 : i32
    %c2_i32_65 = arith.constant 2 : i32
    %87 = arith.muli %c2_i32_64, %c2_i32_65 : i32
    %88 = tpu.assume_multiple %87, 2 : i32
    %89 = arith.index_cast %88 : i32 to index
    %c0_66 = arith.constant 0 : index
    %90 = vector.load %arg10[%89, %c0_66] : memref<16x32xf32, #tpu.memory_space<vmem>>, vector<2x32xf32>
    %cst_67 = arith.constant dense<0.000000e+00> : vector<2x32xf32>
    %91 = tpu.matmul %86, %71, %cst_67 {dimension_numbers = #tpu.dot_dimension_numbers<[1], [0], [0], [1], [0, 0, 1, 1], [], []>} : vector<2x32xf32>, vector<32x32xf32>, vector<2x32xf32> -> vector<2x32xf32>
    %92 = arith.addf %90, %91 : vector<2x32xf32>
    %93 = math.tanh %92 : vector<2x32xf32>
    %c3_i32 = arith.constant 3 : i32
    %c2_i32_68 = arith.constant 2 : i32
    %94 = arith.muli %c3_i32, %c2_i32_68 : i32
    %95 = tpu.assume_multiple %94, 2 : i32
    %96 = arith.index_cast %95 : i32 to index
    %c0_69 = arith.constant 0 : index
    %97 = vector.load %arg10[%96, %c0_69] : memref<16x32xf32, #tpu.memory_space<vmem>>, vector<2x32xf32>
    %cst_70 = arith.constant dense<0.000000e+00> : vector<2x32xf32>
    %98 = tpu.matmul %93, %71, %cst_70 {dimension_numbers = #tpu.dot_dimension_numbers<[1], [0], [0], [1], [0, 0, 1, 1], [], []>} : vector<2x32xf32>, vector<32x32xf32>, vector<2x32xf32> -> vector<2x32xf32>
    %99 = arith.addf %97, %98 : vector<2x32xf32>
    %100 = math.tanh %99 : vector<2x32xf32>
    %c4_i32 = arith.constant 4 : i32
    %c2_i32_71 = arith.constant 2 : i32
    %101 = arith.muli %c4_i32, %c2_i32_71 : i32
    %102 = tpu.assume_multiple %101, 2 : i32
    %103 = arith.index_cast %102 : i32 to index
    %c0_72 = arith.constant 0 : index
    %104 = vector.load %arg10[%103, %c0_72] : memref<16x32xf32, #tpu.memory_space<vmem>>, vector<2x32xf32>
    %cst_73 = arith.constant dense<0.000000e+00> : vector<2x32xf32>
    %105 = tpu.matmul %100, %71, %cst_73 {dimension_numbers = #tpu.dot_dimension_numbers<[1], [0], [0], [1], [0, 0, 1, 1], [], []>} : vector<2x32xf32>, vector<32x32xf32>, vector<2x32xf32> -> vector<2x32xf32>
    %106 = arith.addf %104, %105 : vector<2x32xf32>
    %107 = math.tanh %106 : vector<2x32xf32>
    %c5_i32 = arith.constant 5 : i32
    %c2_i32_74 = arith.constant 2 : i32
    %108 = arith.muli %c5_i32, %c2_i32_74 : i32
    %109 = tpu.assume_multiple %108, 2 : i32
    %110 = arith.index_cast %109 : i32 to index
    %c0_75 = arith.constant 0 : index
    %111 = vector.load %arg10[%110, %c0_75] : memref<16x32xf32, #tpu.memory_space<vmem>>, vector<2x32xf32>
    %cst_76 = arith.constant dense<0.000000e+00> : vector<2x32xf32>
    %112 = tpu.matmul %107, %71, %cst_76 {dimension_numbers = #tpu.dot_dimension_numbers<[1], [0], [0], [1], [0, 0, 1, 1], [], []>} : vector<2x32xf32>, vector<32x32xf32>, vector<2x32xf32> -> vector<2x32xf32>
    %113 = arith.addf %111, %112 : vector<2x32xf32>
    %114 = math.tanh %113 : vector<2x32xf32>
    %c6_i32 = arith.constant 6 : i32
    %c2_i32_77 = arith.constant 2 : i32
    %115 = arith.muli %c6_i32, %c2_i32_77 : i32
    %116 = tpu.assume_multiple %115, 2 : i32
    %117 = arith.index_cast %116 : i32 to index
    %c0_78 = arith.constant 0 : index
    %118 = vector.load %arg10[%117, %c0_78] : memref<16x32xf32, #tpu.memory_space<vmem>>, vector<2x32xf32>
    %cst_79 = arith.constant dense<0.000000e+00> : vector<2x32xf32>
    %119 = tpu.matmul %114, %71, %cst_79 {dimension_numbers = #tpu.dot_dimension_numbers<[1], [0], [0], [1], [0, 0, 1, 1], [], []>} : vector<2x32xf32>, vector<32x32xf32>, vector<2x32xf32> -> vector<2x32xf32>
    %120 = arith.addf %118, %119 : vector<2x32xf32>
    %121 = math.tanh %120 : vector<2x32xf32>
    %c7_i32 = arith.constant 7 : i32
    %c2_i32_80 = arith.constant 2 : i32
    %122 = arith.muli %c7_i32, %c2_i32_80 : i32
    %123 = tpu.assume_multiple %122, 2 : i32
    %124 = arith.index_cast %123 : i32 to index
    %c0_81 = arith.constant 0 : index
    %125 = vector.load %arg10[%124, %c0_81] : memref<16x32xf32, #tpu.memory_space<vmem>>, vector<2x32xf32>
    %cst_82 = arith.constant dense<0.000000e+00> : vector<2x32xf32>
    %126 = tpu.matmul %121, %71, %cst_82 {dimension_numbers = #tpu.dot_dimension_numbers<[1], [0], [0], [1], [0, 0, 1, 1], [], []>} : vector<2x32xf32>, vector<32x32xf32>, vector<2x32xf32> -> vector<2x32xf32>
    %127 = arith.addf %125, %126 : vector<2x32xf32>
    %128 = math.tanh %127 : vector<2x32xf32>
    %c8_i32 = arith.constant 8 : i32
    %c0_83 = arith.constant 0 : index
    %c0_84 = arith.constant 0 : index
    %129 = vector.load %arg6[%c0_83, %c0_84] : memref<32x8xf32, #tpu.memory_space<vmem>>, vector<32x8xf32>
    %cst_85 = arith.constant dense<0.000000e+00> : vector<2x8xf32>
    %130 = tpu.matmul %128, %129, %cst_85 {dimension_numbers = #tpu.dot_dimension_numbers<[1], [0], [0], [1], [0, 0, 1, 1], [], []>} : vector<2x32xf32>, vector<32x8xf32>, vector<2x8xf32> -> vector<2x8xf32>
    %c0_86 = arith.constant 0 : index
    %c0_87 = arith.constant 0 : index
    %131 = vector.load %arg7[%c0_86, %c0_87] : memref<1x8xf32, #tpu.memory_space<vmem>>, vector<1x8xf32>
    %132 = vector.broadcast %131 : vector<1x8xf32> to vector<2x8xf32>
    %133 = arith.addf %130, %132 : vector<2x8xf32>
    %cst_88 = arith.constant dense<0xFF800000> : vector<2xf32>
    %134 = vector.multi_reduction <maximumf>, %133, %cst_88 [1] : vector<2x8xf32> to vector<2xf32>
    %135 = vector.shape_cast %134 : vector<2xf32> to vector<2x1xf32>
    %136 = vector.broadcast %135 : vector<2x1xf32> to vector<2x8xf32>
    %137 = arith.subf %133, %136 : vector<2x8xf32>
    %138 = math.exp %137 : vector<2x8xf32>
    %cst_89 = arith.constant dense<0.000000e+00> : vector<2xf32>
    %139 = vector.multi_reduction <add>, %138, %cst_89 [1] : vector<2x8xf32> to vector<2xf32>
    %140 = vector.shape_cast %139 : vector<2xf32> to vector<2x1xf32>
    %141 = tpu.reciprocal %140 {approx = true} : vector<2x1xf32> -> vector<2x1xf32>
    %142 = vector.broadcast %141 : vector<2x1xf32> to vector<2x8xf32>
    %143 = arith.mulf %138, %142 : vector<2x8xf32>
    %cst_90 = arith.constant 0.000000e+00 : f32
    %144 = vector.broadcast %cst_90 : f32 to vector<2x80xf32>
    %145 = tpu.concatenate %133, %143, %128, %144 in 1 : vector<2x8xf32>, vector<2x8xf32>, vector<2x32xf32>, vector<2x80xf32> -> vector<2x128xf32>
    %c0_91 = arith.constant 0 : index
    %c0_92 = arith.constant 0 : index
    %146 = vector.load %arg8[%c0_91, %c0_92] : memref<2x128xf32, #tpu.memory_space<vmem>>, vector<2x128xf32>
    tpu.vector_store %arg8[%c0_91, %c0_92], %145 {strides = array<i32>} : memref<2x128xf32, #tpu.memory_space<vmem>>, vector<2x128xf32>,
    return
  }
  func.func @transform_0(%arg0: i32, %arg1: memref<16xi32, #tpu.memory_space<smem>>) -> (i32, i32) {
    %c0_i32 = arith.constant 0 : i32
    %c0_i32_0 = arith.constant 0 : i32
    %c0_i32_1 = arith.constant 0 : i32
    return %c0_i32, %c0_i32_0 : i32, i32
  }
  func.func @transform_1(%arg0: i32, %arg1: memref<16xi32, #tpu.memory_space<smem>>) -> (i32, i32) {
    %c0_i32 = arith.constant 0 : i32
    %c0_i32_0 = arith.constant 0 : i32
    %c0_i32_1 = arith.constant 0 : i32
    return %c0_i32, %c0_i32_0 : i32, i32
  }
  func.func @transform_2(%arg0: i32, %arg1: memref<16xi32, #tpu.memory_space<smem>>) -> (i32, i32) {
    %c0_i32 = arith.constant 0 : i32
    %c0_i32_0 = arith.constant 0 : i32
    %c0_i32_1 = arith.constant 0 : i32
    return %c0_i32, %c0_i32_0 : i32, i32
  }
  func.func @transform_3(%arg0: i32, %arg1: memref<16xi32, #tpu.memory_space<smem>>) -> (i32, i32) {
    %c0_i32 = arith.constant 0 : i32
    %c0_i32_0 = arith.constant 0 : i32
    %c0_i32_1 = arith.constant 0 : i32
    return %c0_i32, %c0_i32_0 : i32, i32
  }
  func.func @transform_4(%arg0: i32, %arg1: memref<16xi32, #tpu.memory_space<smem>>) -> (i32, i32) {
    %c0_i32 = arith.constant 0 : i32
    %c0_i32_0 = arith.constant 0 : i32
    %c0_i32_1 = arith.constant 0 : i32
    return %c0_i32, %c0_i32_0 : i32, i32
  }
  func.func @transform_5(%arg0: i32, %arg1: memref<16xi32, #tpu.memory_space<smem>>) -> (i32, i32) {
    %c0_i32 = arith.constant 0 : i32
    %c0_i32_0 = arith.constant 0 : i32
    %c0_i32_1 = arith.constant 0 : i32
    return %c0_i32, %c0_i32_0 : i32, i32
  }
  func.func @transform_6(%arg0: i32, %arg1: memref<16xi32, #tpu.memory_space<smem>>) -> (i32, i32) {
    %c0_i32 = arith.constant 0 : i32
    %c0_i32_0 = arith.constant 0 : i32
    %c0_i32_1 = arith.constant 0 : i32
    return %c0_i32, %c0_i32_0 : i32, i32
  }
}

</mosaic_0001>

<bundles_post_ra>
// kernel: rnn_forward.1
= control target key start
LH: loop header
LB: loop body
LE: loop exit
PB: predicated region body
PF: predicated region fallthrough
CT: control target
= control target key end

     0   :  { %s1564_s0 = inlined_call_operand.vmem [shape: s32[16], index: 0, kind: input, shape index: {}]   ;;  %s1565_s1 = inlined_call_operand.vmem [shape: f32[50,16], index: 1, kind: input, shape index: {}]   ;;  %s1566_s2 = inlined_call_operand.vmem [shape: f32[16,32], index: 2, kind: input, shape index: {}]   ;;  %s1567_s3 = inlined_call_operand.vmem [shape: f32[32,32], index: 3, kind: input, shape index: {}]   ;;  %s1568_s4 = inlined_call_operand.vmem [shape: f32[1,32], index: 4, kind: input, shape index: {}]   ;;  %s1569_s5 = inlined_call_operand.vmem [shape: f32[32,8], index: 5, kind: input, shape index: {}]   ;;  %s1570_s6 = inlined_call_operand.vmem [shape: f32[1,8], index: 6, kind: input, shape index: {}]   ;;  %s1571_s7 = inlined_call_operand.vmem [shape: f32[2,128], index: 7, kind: output, shape index: {}]  }
   0x1   :  { %s12_s26 = sshll.u32 %s1564_s0, 4  ;;  %s13_s26 = int_to_ptr.vmem [resolvable:$true] %s12_s26 }
   0x2   :  { %s1283_s27 = scalar_lea.vmem %s13_s26, 16  ;;  %p1288_p1 = scmp.lt.s32.totalorder %s13_s26, %s13_s26 }
   0x3   :  { %p1284_p0 = scmp.ne.s32.totalorder %s13_s26, %s1283_s27  ;;  %p1289_p2 = scmp.lt.s32.totalorder %s1283_s27, %s1283_s27 }
   0x5   :  { %p1290_p3 = por %p1289_p2, %p1288_p1 }
   0x7   :  { %p1291_p4 = pnand %p1290_p3, %p1284_p0 }
   0x9   :  { %1294 = shalt.err (!%p1291_p4)  }
   0xa   :  { %s1297_s28 = smov [#allocation5]  }
   0xb   :  { %15 = dma.vmem_to_smem %s13_s26, 16, %s1297_s28, [#allocation4] }
   0xc   :  { %1295 = dma.done.wait [#allocation4], 16 }
   0xd   :  { %1296 = vsyncadd [#allocation4], 4294967280 }
   0xe   :  { %17 = sfence }
   0xf   :  { %v37_v0 = vld [vmem:[%s1566_s2] sm:$0xff]  ;;  %v38_v1 = vld [vmem:[%s1566_s2 + $0x8] sm:$0xff]  ;;  %v1298_v2 = vmov 0.0|0.0   ;;  %vm1299_vm0 = vmmov 0   ;;  %v1300_v4 = vmov 0.0   ;;  %vm46_vm1 = vcmask 130048  }
  0x10   :  { %1200 = vmatprep.subr.bf16.mxu0 %v1298_v2  ;;  %v1201_v3 = vpack.c.bf16 %v38_v1, %v37_v0  ;;  %1080 = vmatprep.mubr.msk.f32.mxu0 %vm1299_vm0, %v1300_v4  ;;  %v30_v5 = vld [vmem:[%s1565_s1] sm:$0xff]  ;;  %v243_v7 = vld [vmem:[%s1567_s3 + $0x8] sm:$0xff]  ;;  %v244_v8 = vld [vmem:[%s1567_s3 + $0x10] sm:$0xff]  ;;  %vm168_vm2 = vcmask 261120   ;;  %s1444_s8 = sld [smem:[#allocation5 + $0x1]]  ;;  %s1448_s0 = sld [smem:[#allocation5 + $0x2]] }
  0x11   :  { %1203 = vmatprep.subr.bf16.mxu1 %v1298_v2  ;;  %1109 = vmatprep.mubr.msk.f32.mxu1 %vm1299_vm0, %v1300_v4  ;;  %v242_v6 = vld [vmem:[%s1567_s3] sm:$0xff]  ;;  %v245_v10 = vld [vmem:[%s1567_s3 + $0x18] sm:$0xff]  ;;  %v31_v12 = vld [vmem:[%s1565_s1 + $0x8] sm:$0xff]  ;;  %s1446_s9 = sld [smem:[#allocation5 + $0x9]]  ;;  %s1450_s10 = sld [smem:[#allocation5 + $0xa]]  ;;  %vm175_vm3 = vcmask 254976  }
  0x12   :  { %1202 = vmatpush3.bf16.msra.mxu0 %v1201_v3  ;;  %v1370_v9 = vpack.c.bf16 %v243_v7, %v242_v6  ;;  %v1378_v11 = vpack.c.bf16 %v245_v10, %v244_v8  ;;  %v32_v13 = vld [vmem:[%s1565_s1 + $0x10] sm:$0xff]  ;;  %v33_v14 = vld [vmem:[%s1565_s1 + $0x18] sm:$0xff]  ;;  %v34_v15 = vld [vmem:[%s1565_s1 + $0x20] sm:$0xff]  ;;  %s1452_s2 = sld [smem:[#allocation5 + $0x3]]  ;;  %s1456_s12 = sld [smem:[#allocation5 + $0x4]]  ;;  %vm180_vm4 = vcmask 253952  }
  0x13   :  { %1221 = vmatprep.subr.bf16.mxu0 %v1298_v2  ;;  %v35_v16 = vld [vmem:[%s1565_s1 + $0x28] sm:$0xff]  ;;  %v36_v17 = vld [vmem:[%s1565_s1 + $0x30] sm:$0x3]  ;;  %v990_v18 = vld [vmem:[%s1568_s4] ss:$0 sm:$0xff]  ;;  %s177_s1 = sld [smem:[#allocation5]] }
  0x14   :  { %1205 = vmatpush3.bf16.msra.mxu1 %v1370_v9  ;;  %s1441_s4 = sld [smem:[#allocation5 + $0x8]]  ;;  %s1454_s11 = sld [smem:[#allocation5 + $0xb]]  ;;  %vm945_vm5 = vcmask 58368   ;;  %vm964_vm6 = vcmask 64512   ;;  %vm967_vm7 = vcmask 392192  }
  0x15   :  { %1081 = vmatmul.mubr.msk.f32.vlgmr.msra.gmra.mrb[0].mxu0 %vm46_vm1, %v30_v5  ;;  %1206 = vmatprep.subr.bf16.mxu1 %v1298_v2  ;;  %s1458_s13 = sld [smem:[#allocation5 + $0xc]]  ;;  %s1461_s14 = sld [smem:[#allocation5 + $0x5]] }
  0x16   :  { %1083 = vmatprep.mubr.msk.f32.mxu0 %vm1299_vm0, %v1300_v4  ;;  %1223 = vmatpush3.bf16.msra.mxu0 %v1370_v9  ;;  %s1463_s15 = sld [smem:[#allocation5 + $0xd]]  ;;  %s1465_s16 = sld [smem:[#allocation5 + $0x6]] }
  0x17   :  { %1224 = vmatprep.subr.bf16.mxu0 %v1298_v2  ;;  %s1467_s17 = sld [smem:[#allocation5 + $0xe]]  ;;  %s1469_s18 = sld [smem:[#allocation5 + $0x7]] }
  0x18   :  { %1208 = vmatpush3.bf16.msra.mxu1 %v1378_v11  ;;  %s1471_s19 = sld [smem:[#allocation5 + $0xf]]  ;;  %s187_s21 = scalar_lea.vmem [#allocation2], %s1444_s8 }
  0x19   :  { %1084 = vmatmul.mubr.msk.f32.gmra.mrb[2].mxu0 %vm46_vm1, %v31_v12  ;;  %1209 = vmatprep.subr.bf16.mxu1 %v1298_v2  ;;  %s178_s3 = scalar_lea.vmem [#allocation2], %s177_s1  ;;  %s191_s22 = scalar_lea.vmem [#allocation2], %s1446_s9 }
  0x1a   :  { %1086 = vmatprep.mubr.msk.f32.mxu0 %vm1299_vm0, %v1300_v4  ;;  %1226 = vmatpush3.bf16.msra.mxu0 %v1378_v11  ;;  %s183_s20 = scalar_lea.vmem [#allocation2], %s1441_s4  ;;  %s195_s23 = scalar_lea.vmem [#allocation2], %s1448_s0 }
  0x1b   :  { %1110 = vmatmul.mubr.f32.vlgmr.msra.gmra.mrb[0].mxu1 %v1300_v4  ;;  %1233 = vmatprep.subr.bf16.mxu0 %v1298_v2  ;;  %s199_s24 = scalar_lea.vmem [#allocation2], %s1450_s10  ;;  %s203_s25 = scalar_lea.vmem [#allocation2], %s1452_s2 }
  0x1c   :  { %1211 = vmatpush3.bf16.msra.mxu1 %v1370_v9  ;;  %1120 = vmatprep.mubr.msk.f32.mxu1 %vm1299_vm0, %v1300_v4  ;;  %s207_s26 = scalar_lea.vmem [#allocation2], %s1454_s11  ;;  %s211_s27 = scalar_lea.vmem [#allocation2], %s1456_s12 }
  0x1d   :  { %1087 = vmatmul.mubr.msk.f32.gmra.mrb[4].mxu0 %vm46_vm1, %v32_v13  ;;  %1212 = vmatprep.subr.bf16.mxu1 %v1298_v2  ;;  %s215_s28 = scalar_lea.vmem [#allocation2], %s1458_s13  ;;  %s219_s29 = scalar_lea.vmem [#allocation2], %s1461_s14 }
  0x1e   :  { %1089 = vmatprep.mubr.msk.f32.mxu0 %vm1299_vm0, %v1300_v4  ;;  %s223_s30 = scalar_lea.vmem [#allocation2], %s1463_s15  ;;  %s227_s1 = scalar_lea.vmem [#allocation2], %s1465_s16 }
  0x1f   :  { %s231_s4 = scalar_lea.vmem [#allocation2], %s1467_s17  ;;  %s235_s8 = scalar_lea.vmem [#allocation2], %s1469_s18 }
  0x20   :  { %1214 = vmatpush3.bf16.msra.mxu1 %v1378_v11  ;;  %s239_s9 = scalar_lea.vmem [#allocation2], %s1471_s19 }
  0x21   :  { %1090 = vmatmul.mubr.msk.f32.gmra.mrb[6].mxu0 %vm46_vm1, %v33_v14  ;;  %1215 = vmatprep.subr.bf16.mxu1 %v1298_v2 }
  0x22   :  { %1092 = vmatprep.mubr.msk.f32.mxu0 %vm1299_vm0, %v1300_v4 }
  0x25   :  { %1093 = vmatmul.mubr.msk.f32.gmra.mrb[8].mxu0 %vm46_vm1, %v34_v15 }
  0x26   :  { %1095 = vmatprep.mubr.msk.f32.mxu0 %vm1299_vm0, %v1300_v4 }
  0x29   :  { %1096 = vmatmul.mubr.msk.f32.gmra.mrb[10].mxu0 %vm46_vm1, %v35_v16 }
  0x2a   :  { %1098 = vmatprep.mubr.msk.f32.mxu0 %vm1299_vm0, %v1300_v4 }
  0x2d   :  { %1099 = vmatmul.mubr.msk.f32.gmra.mrb[12].mxu0 %vm46_vm1, %v36_v17 }
  0x2e   :  { %1142 = vmatprep.mubr.msk.f32.mxu0 %vm1299_vm0, %v1300_v4 }
  0xe8   :  { %v134_v19 = vpop.f32.mrb[0].mxu0 }
  0xe9   :  { %v135_v20 = vadd.f32 %v990_v18, %v134_v19  ;;  %v1082_v21 = vpop.f32.mrb[1].mxu0 }
  0xeb   :  { %169 = vst.msk [vmem:[#allocation2] sm:$0xff] %vm168_vm2, %v135_v20 }
  0xec   :  { %v139_v22 = vpop.f32.mrb[2].mxu0 }
  0xed   :  { %v140_v23 = vadd.f32 %v990_v18, %v139_v22  ;;  %v1085_v24 = vpop.f32.mrb[3].mxu0 }
  0xee   :  { %v1437_v25 = vpop.f32.mrb[0].mxu1 }
  0xef   :  { %170 = vst.msk [vmem:[#allocation2 + $0x8] sm:$0xff] %vm168_vm2, %v140_v23  ;;  %v1111_v27 = vpop.f32.mrb[1].mxu1 }
  0xf0   :  { %v144_v26 = vpop.f32.mrb[4].mxu0 }
  0xf1   :  { %v145_v28 = vadd.f32 %v990_v18, %v144_v26  ;;  %v1088_v29 = vpop.f32.mrb[5].mxu0 }
  0xf3   :  { %171 = vst.msk [vmem:[#allocation2 + $0x10] sm:$0xff] %vm168_vm2, %v145_v28 }
  0xf4   :  { %v149_v30 = vpop.f32.mrb[6].mxu0 }
  0xf5   :  { %v150_v31 = vadd.f32 %v990_v18, %v149_v30  ;;  %v1091_v32 = vpop.f32.mrb[7].mxu0  ;;  %v862_v30 = vld [vmem:[%s1569_s5 + $0x8] sm:$0xff] }
  0xf6   :  { %v864_v32 = vld [vmem:[%s1569_s5 + $0x18] sm:$0xff] }
  0xf7   :  { %172 = vst.msk [vmem:[#allocation2 + $0x18] sm:$0xff] %vm168_vm2, %v150_v31 }
  0xf8   :  { %v154_v33 = vpop.f32.mrb[8].mxu0 }
  0xf9   :  { %v155_v34 = vadd.f32 %v990_v18, %v154_v33  ;;  %v1094_v35 = vpop.f32.mrb[9].mxu0 }
  0xfb   :  { %173 = vst.msk [vmem:[#allocation2 + $0x20] sm:$0xff] %vm168_vm2, %v155_v34 }
  0xfc   :  { %v159_v36 = vpop.f32.mrb[10].mxu0 }
  0xfd   :  { %v160_v37 = vadd.f32 %v990_v18, %v159_v36  ;;  %v1097_v38 = vpop.f32.mrb[11].mxu0 }
  0xff   :  { %174 = vst.msk [vmem:[#allocation2 + $0x28] sm:$0xff] %vm168_vm2, %v160_v37 }
 0x100   :  { %v164_v39 = vpop.f32.mrb[12].mxu0 }
 0x101   :  { %v165_v40 = vadd.f32 %v990_v18, %v164_v39  ;;  %v1100_v41 = vpop.f32.mrb[13].mxu0  ;;  %v1020_v39 = vld [vmem:[%s1570_s6] ss:$0 sm:$0xff]  ;;  %s1302_s6 = smov 16  }
 0x103   :  { %176 = vst.msk [vmem:[#allocation2 + $0x30] sm:$0x3] %vm175_vm3, %v165_v40 }
 0x10a   :  { %v179_v42 = vld [vmem:[%s178_s3] sm:$0x1] }
 0x10b   :  { %v184_v43 = vld [vmem:[%s183_s20] sm:$0x1]  ;;  %181 = vst.msk [vmem:[#allocation3] sm:$0x1] %vm180_vm4, %v179_v42 }
 0x10c   :  { %v188_v44 = vld [vmem:[%s187_s21] sm:$0x1]  ;;  %185 = vst.msk [vmem:[#allocation3 + $0x1] sm:$0x1] %vm180_vm4, %v184_v43 }
 0x10d   :  { %189 = vst.msk [vmem:[#allocation3 + $0x2] sm:$0x1] %vm180_vm4, %v188_v44  ;;  %v192_v45 = vld [vmem:[%s191_s22] sm:$0x1] }
 0x10e   :  { %v196_v46 = vld [vmem:[%s195_s23] sm:$0x1]  ;;  %193 = vst.msk [vmem:[#allocation3 + $0x3] sm:$0x1] %vm180_vm4, %v192_v45 }
 0x10f   :  { %v200_v47 = vld [vmem:[%s199_s24] sm:$0x1]  ;;  %197 = vst.msk [vmem:[#allocation3 + $0x4] sm:$0x1] %vm180_vm4, %v196_v46 }
 0x110   :  { %201 = vst.msk [vmem:[#allocation3 + $0x5] sm:$0x1] %vm180_vm4, %v200_v47  ;;  %v204_v48 = vld [vmem:[%s203_s25] sm:$0x1] }
 0x111   :  { %v208_v49 = vld [vmem:[%s207_s26] sm:$0x1]  ;;  %205 = vst.msk [vmem:[#allocation3 + $0x6] sm:$0x1] %vm180_vm4, %v204_v48 }
 0x112   :  { %v212_v50 = vld [vmem:[%s211_s27] sm:$0x1]  ;;  %209 = vst.msk [vmem:[#allocation3 + $0x7] sm:$0x1] %vm180_vm4, %v208_v49 }
 0x113   :  { %213 = vst.msk [vmem:[#allocation3 + $0x8] sm:$0x1] %vm180_vm4, %v212_v50  ;;  %v216_v51 = vld [vmem:[%s215_s28] sm:$0x1]  ;;  %v246_v58 = vld [vmem:[#allocation3] sm:$0x3] }
 0x114   :  { %v220_v52 = vld [vmem:[%s219_s29] sm:$0x1]  ;;  %217 = vst.msk [vmem:[#allocation3 + $0x9] sm:$0x1] %vm180_vm4, %v216_v51  ;;  %v320_v59 = vadd.f32 %v1437_v25, %v246_v58 }
 0x115   :  { %v224_v53 = vld [vmem:[%s223_s30] sm:$0x1]  ;;  %221 = vst.msk [vmem:[#allocation3 + $0xa] sm:$0x1] %vm180_vm4, %v220_v52  ;;  %v323_v61 = vld [vmem:[#allocation3 + $0x2] sm:$0x3] }
 0x116   :  { %225 = vst.msk [vmem:[#allocation3 + $0xb] sm:$0x1] %vm180_vm4, %v224_v53  ;;  %v228_v54 = vld [vmem:[%s227_s1] sm:$0x1]  ;;  %1263 = vtanh.f32 %v320_v59 }
 0x117   :  { %v232_v55 = vld [vmem:[%s231_s4] sm:$0x1]  ;;  %229 = vst.msk [vmem:[#allocation3 + $0xc] sm:$0x1] %vm180_vm4, %v228_v54  ;;  %v400_v3 = vld [vmem:[#allocation3 + $0x4] sm:$0x3] }
 0x118   :  { %v236_v56 = vld [vmem:[%s235_s8] sm:$0x1]  ;;  %233 = vst.msk [vmem:[#allocation3 + $0xd] sm:$0x1] %vm180_vm4, %v232_v55 }
 0x119   :  { %237 = vst.msk [vmem:[#allocation3 + $0xe] sm:$0x1] %vm180_vm4, %v236_v56  ;;  %v240_v57 = vld [vmem:[%s239_s9] sm:$0x1]  ;;  %v477_v10 = vld [vmem:[#allocation3 + $0x6] sm:$0x3] }
 0x11a   :  { %241 = vst.msk [vmem:[#allocation3 + $0xf] sm:$0x1] %vm180_vm4, %v240_v57 }
 0x11b   :  { %v554_v16 = vld [vmem:[#allocation3 + $0x8] sm:$0x3] }
 0x11d   :  { %v631_v21 = vld [vmem:[#allocation3 + $0xa] sm:$0x3] }
 0x11f   :  { %v708_v26 = vld [vmem:[#allocation3 + $0xc] sm:$0x3] }
 0x120   :  { %v1264_v60 = vpop.eup %1263 }
 0x121   :  { %1121 = vmatmul.mubr.msk.f32.vlgmr.msra.gmra.mrb[2].mxu1 %vm168_vm2, %v1264_v60  ;;  %v785_v34 = vld [vmem:[#allocation3 + $0xe] sm:$0x3] }
 0x122   :  { %1217 = vmatpush3.bf16.msra.mxu1 %v1370_v9  ;;  %1131 = vmatprep.mubr.msk.f32.mxu1 %vm1299_vm0, %v1300_v4 }
 0x123   :  { %1218 = vmatprep.subr.bf16.mxu1 %v1298_v2 }
 0x126   :  { %1220 = vmatpush3.bf16.msra.mxu1 %v1378_v11 }
 0x127   :  { %1227 = vmatprep.subr.bf16.mxu1 %v1298_v2 }
 0x1f4   :  { %v393_v62 = vpop.f32.mrb[2].mxu1 }
 0x1f5   :  { %v397_v63 = vadd.f32 %v393_v62, %v323_v61  ;;  %v1122_v0 = vpop.f32.mrb[3].mxu1 }
 0x1f7   :  { %1265 = vtanh.f32 %v397_v63 }
 0x201   :  { %v1266_v1 = vpop.eup %1265 }
 0x202   :  { %1132 = vmatmul.mubr.msk.f32.vlgmr.msra.gmra.mrb[4].mxu1 %vm168_vm2, %v1266_v1 }
 0x203   :  { %1229 = vmatpush3.bf16.msra.mxu1 %v1370_v9  ;;  %1153 = vmatprep.mubr.msk.f32.mxu1 %vm1299_vm0, %v1300_v4 }
 0x204   :  { %1230 = vmatprep.subr.bf16.mxu1 %v1298_v2 }
 0x207   :  { %1232 = vmatpush3.bf16.msra.mxu1 %v1378_v11 }
 0x208   :  { %1239 = vmatprep.subr.bf16.mxu1 %v1298_v2 }
 0x2d5   :  { %v470_v5 = vpop.f32.mrb[4].mxu1 }
 0x2d6   :  { %v474_v6 = vadd.f32 %v470_v5, %v400_v3  ;;  %v1133_v7 = vpop.f32.mrb[5].mxu1 }
 0x2d8   :  { %1267 = vtanh.f32 %v474_v6 }
 0x2e2   :  { %v1268_v8 = vpop.eup %1267 }
 0x2e3   :  { %1143 = vmatmul.mubr.msk.f32.vlgmr.msra.gmra.mrb[14].mxu0 %vm168_vm2, %v1268_v8 }
 0x2e4   :  { %1235 = vmatpush3.bf16.msra.mxu0 %v1370_v9  ;;  %1164 = vmatprep.mubr.msk.f32.mxu0 %vm1299_vm0, %v1300_v4 }
 0x2e5   :  { %1236 = vmatprep.subr.bf16.mxu0 %v1298_v2 }
 0x2e8   :  { %1238 = vmatpush3.bf16.msra.mxu0 %v1378_v11 }
 0x2e9   :  { %1245 = vmatprep.subr.bf16.mxu0 %v1298_v2 }
 0x3b6   :  { %v547_v12 = vpop.f32.mrb[14].mxu0 }
 0x3b7   :  { %v551_v13 = vadd.f32 %v547_v12, %v477_v10  ;;  %v1144_v14 = vpop.f32.mrb[15].mxu0 }
 0x3b9   :  { %1269 = vtanh.f32 %v551_v13 }
 0x3c3   :  { %v1270_v15 = vpop.eup %1269 }
 0x3c4   :  { %1154 = vmatmul.mubr.msk.f32.vlgmr.msra.gmra.mrb[6].mxu1 %vm168_vm2, %v1270_v15 }
 0x3c5   :  { %1241 = vmatpush3.bf16.msra.mxu1 %v1370_v9  ;;  %1175 = vmatprep.mubr.msk.f32.mxu1 %vm1299_vm0, %v1300_v4 }
 0x3c6   :  { %1242 = vmatprep.subr.bf16.mxu1 %v1298_v2 }
 0x3c9   :  { %1244 = vmatpush3.bf16.msra.mxu1 %v1378_v11 }
 0x3ca   :  { %1251 = vmatprep.subr.bf16.mxu1 %v1298_v2 }
 0x497   :  { %v624_v17 = vpop.f32.mrb[6].mxu1 }
 0x498   :  { %v628_v18 = vadd.f32 %v624_v17, %v554_v16  ;;  %v1155_v19 = vpop.f32.mrb[7].mxu1 }
 0x49a   :  { %1271 = vtanh.f32 %v628_v18 }
 0x4a4   :  { %v1272_v20 = vpop.eup %1271 }
 0x4a5   :  { %1165 = vmatmul.mubr.msk.f32.vlgmr.msra.gmra.mrb[16].mxu0 %vm168_vm2, %v1272_v20 }
 0x4a6   :  { %1247 = vmatpush3.bf16.msra.mxu0 %v1370_v9  ;;  %1186 = vmatprep.mubr.msk.f32.mxu0 %vm1299_vm0, %v1300_v4 }
 0x4a7   :  { %1248 = vmatprep.subr.bf16.mxu0 %v1298_v2 }
 0x4aa   :  { %1250 = vmatpush3.bf16.msra.mxu0 %v1378_v11  ;;  %v861_v11 = vld [vmem:[%s1569_s5] sm:$0xff] }
 0x4ab   :  { %v1252_v31 = vpack.c.bf16 %v862_v30, %v861_v11 }
 0x578   :  { %v701_v22 = vpop.f32.mrb[16].mxu0 }
 0x579   :  { %v705_v23 = vadd.f32 %v701_v22, %v631_v21  ;;  %v1166_v24 = vpop.f32.mrb[17].mxu0 }
 0x57b   :  { %1273 = vtanh.f32 %v705_v23 }
 0x585   :  { %v1274_v25 = vpop.eup %1273 }
 0x586   :  { %1176 = vmatmul.mubr.msk.f32.vlgmr.msra.gmra.mrb[8].mxu1 %vm168_vm2, %v1274_v25 }
 0x587   :  { %1197 = vmatprep.mubr.msk.f32.mxu1 %vm1299_vm0, %v1300_v4  ;;  %v863_v4 = vld [vmem:[%s1569_s5 + $0x10] sm:$0xff]  ;;  %1253 = vmatpush3.bf16.msra.mxu1 %v1252_v31  ;;  %s1301_s5 = smov 8  }
 0x588   :  { %v1255_v33 = vpack.c.bf16 %v864_v32, %v863_v4  ;;  %1254 = vmatprep.subr.bf16.mxu1 %v1298_v2 }
 0x58b   :  { %1256 = vmatpush3.bf16.msra.mxu1 %v1255_v33 }
 0x659   :  { %v778_v9 = vpop.f32.mrb[8].mxu1 }
 0x65a   :  { %v782_v27 = vadd.f32 %v778_v9, %v708_v26  ;;  %v1177_v28 = vpop.f32.mrb[9].mxu1 }
 0x65c   :  { %1275 = vtanh.f32 %v782_v27 }
 0x666   :  { %v1276_v29 = vpop.eup %1275 }
 0x667   :  { %1187 = vmatmul.mubr.msk.f32.vlgmr.msra.gmra.mrb[18].mxu0 %vm168_vm2, %v1276_v29 }
 0x73a   :  { %v855_v35 = vpop.f32.mrb[18].mxu0 }
 0x73b   :  { %v859_v36 = vadd.f32 %v855_v35, %v785_v34  ;;  %v1188_v37 = vpop.f32.mrb[19].mxu0 }
 0x73d   :  { %1277 = vtanh.f32 %v859_v36 }
 0x747   :  { %v1278_v38 = vpop.eup %1277 }
 0x748   :  { %1198 = vmatmul.mubr.msk.f32.vlgmr.msra.gmra.mrb[10].mxu1 %vm168_vm2, %v1278_v38 }
 0x81b   :  { %v941_v40 = vpop.f32.mrb[10].mxu1 }
 0x81c   :  { %v942_v41 = vadd.f32 %v1020_v39, %v941_v40  ;;  %v1199_v42 = vpop.f32.mrb[11].mxu1 }
 0x81e   :  { %v946_v43 = vsel %vm945_vm5, %v942_v41, -inf }
 0x81f   :  { %947 = vmax.xlane.f32.xlu0 %v946_v43 }
 0x8ac   :  { %v948_v2 = vpop.xlane.xlu0 %947 }
 0x8ad   :  { %v949_v44 = vsub.f32 %v942_v41, %v948_v2 }
 0x8af   :  { %v950_v45 = vmul.f32 1.442695, %v949_v44 }
 0x8b1   :  { %1279 = vpow2.f32 %v950_v45 }
 0x8bb   :  { %v1280_v46 = vpop.eup %1279 }
 0x8bc   :  { %v952_v47 = vsel %vm945_vm5, %v1280_v46, 0.0 }
 0x8bd   :  { %953 = vadd.xlane.f32.xlu0 %v952_v47 }
 0x94a   :  { %v954_v48 = vpop.xlane.xlu0 %953 }
 0x94b   :  { %1281 = vrcp.f32 %v954_v48 }
 0x955   :  { %v1282_v49 = vpop.eup %1281 }
 0x956   :  { %v956_v50 = vmul.f32 %v1282_v49, %v1280_v46 }
 0x958   :  { %958 = vrot.lane.b32.xlu1 %v956_v50, %s1301_s5 }
 0x95c   :  { %961 = vrot.lane.b32.xlu1 %v1278_v38, %s1302_s6 }
 0x9ca   :  { %v959_v51 = vpop.permute.xlu1 %958 }
 0x9cb   :  { %v965_v52 = vsel %vm964_vm6, %v942_v41, %v959_v51 }
 0x9ce   :  { %v962_v53 = vpop.permute.xlu1 %961 }
 0x9cf   :  { %v966_v54 = vsel %vm46_vm1, %v965_v52, %v962_v53 }
 0x9d0   :  { %v968_v55 = vsel %vm967_vm7, %v966_v54, 0.0 }
 0x9d1   :  { %969 = vst [vmem:[%s1571_s7] sm:$0x3] %v968_v55 }

</bundles_post_ra>
